<compile_context>
chip_gen: v7x
topology: tpu7x:2x2x1
jax: 0.10.0
libtpu: 0.0.40
codegen_flags: <defaults>
</compile_context>

<pallas_src>
import math

import jax
import jax.numpy as jnp
import numpy as np
from jax.experimental import pallas as pl
from jax.experimental.pallas import tpu as pltpu


def _round_up(x, m):
    return (x + m - 1) // m * m


# ----------------------------- Pallas kernel ---------------------------------
def moe_expert_kernel(x_ref, gate_ref, w13_ref, w2_ref, out_ref, acc_ref):
    """grid = (token_tiles, experts, h_tiles).

    x_ref   : (tn, D)      bf16   (resident across e, h)
    gate_ref: (tn, 1)      f32    (per-expert gate column, resident across h)
    w13_ref : (D, 2*th)    bf16   fused [w1 | w3] tile for this (expert, h-tile)
    w2_ref  : (th, D)      bf16   down-projection tile
    out_ref : (tn, D)      f32    written once, at the last (e, h) step
    acc_ref : (tn, D)      f32    VMEM accumulator scratch
    """
    e = pl.program_id(1)
    h = pl.program_id(2)
    th = w2_ref.shape[0]

    @pl.when(jnp.logical_and(e == 0, h == 0))
    def _init():
        acc_ref[...] = jnp.zeros_like(acc_ref)

    x = x_ref[...]                                            # (tn, D)   bf16
    w13 = w13_ref[...]                                        # (D, 2*th) bf16

    # Fused up-projection: one MXU matmul for both w1 and w3, f32 accumulation.
    up = jnp.dot(x, w13, preferred_element_type=jnp.float32)  # (tn, 2*th) f32
    h1 = up[:, :th]
    h3 = up[:, th:]

    gate = gate_ref[...]                                      # (tn, 1) f32
    # SiLU(w1 x) * (w3 x), gate folded in before the down-projection
    # (linear in h, so identical to scaling the expert output).
    hact = (h1 * jax.nn.sigmoid(h1)) * h3 * gate              # (tn, th) f32

    acc_ref[...] += jnp.dot(hact.astype(w2_ref.dtype), w2_ref[...],
                            preferred_element_type=jnp.float32)

    @pl.when(jnp.logical_and(e == pl.num_programs(1) - 1,
                             h == pl.num_programs(2) - 1))
    def _finalize():
        out_ref[...] = acc_ref[...].astype(out_ref.dtype)


# --------------------------- one-time weight prep ------------------------------
def prepare_moe_weights(params, *, block_hidden=512):
    """Call ONCE (at parameter init), not per forward.

    Produces MXU-natural, bf16, h-tiled weight layouts:
      w13 : (E, n_h, D, 2*th)  — per-h-tile fused [w1 | w3] up-projection
      w2_t: (E, H_pad, D)      — down-projection (contraction dim leading)
    `block_hidden` should be a multiple of 128 when H > block_hidden
    (lane-tile aligned split of the fused up-projection).
    """
    w1, w3, w2 = params["w1"], params["w3"], params["w2"]  # (E,H,D),(E,H,D),(E,D,H)
    E, H, D = w1.shape

    th = H if H <= block_hidden else block_hidden
    H_pad = _round_up(H, th)
    if H_pad != H:
        # zero-padded hidden units contribute exactly 0 to the output
        w1 = jnp.pad(w1, ((0, 0), (0, H_pad - H), (0, 0)))
        w3 = jnp.pad(w3, ((0, 0), (0, H_pad - H), (0, 0)))
        w2 = jnp.pad(w2, ((0, 0), (0, 0), (0, H_pad - H)))
    n_h = H_pad // th

    bf = jnp.bfloat16
    w1_t = jnp.swapaxes(w1, 1, 2).astype(bf)                      # (E, D, H_pad)
    w3_t = jnp.swapaxes(w3, 1, 2).astype(bf)                      # (E, D, H_pad)
    w1_b = jnp.transpose(w1_t.reshape(E, D, n_h, th), (0, 2, 1, 3))  # (E, n_h, D, th)
    w3_b = jnp.transpose(w3_t.reshape(E, D, n_h, th), (0, 2, 1, 3))  # (E, n_h, D, th)
    w13 = jnp.concatenate([w1_b, w3_b], axis=-1)                  # (E, n_h, D, 2*th)

    w2_t = jnp.swapaxes(w2, 1, 2).astype(bf)                      # (E, H_pad, D)

    return {"router": params["router"], "w13": w13, "w2_t": w2_t}


# ------------------------------ pallas wrapper ---------------------------------
def moe_experts_pallas(x_flat, gate_e, w13, w2_t, *, block_tokens=512):
    """x_flat: (N, D) bf16; gate_e: (E, N, 1) f32;
    w13: (E, n_h, D, 2*th) bf16; w2_t: (E, H_pad, D) bf16."""
    N, D = x_flat.shape
    E, n_h, _, two_th = w13.shape
    th = two_th // 2

    # Token tile: multiple of 16 (bf16 sublane packing).  Raise block_tokens per
    # generation for real shapes (v5e ~256, v7x ~512, v6e ~1024) — see review.
    tn = block_tokens if N >= block_tokens else _round_up(N, 16)
    tn = _round_up(tn, 16)
    N_pad = _round_up(N, tn)
    if N_pad != N:
        x_flat = jnp.pad(x_flat, ((0, N_pad - N), (0, 0)))
        gate_e = jnp.pad(gate_e, ((0, 0), (0, N_pad - N), (0, 0)))
    n_tok = N_pad // tn

    # Explicit scoped-VMEM limit from the tile footprint (double-buffered inputs
    # + f32 output double-buffer + f32 accumulator).  Capped at 64 MiB so the
    # same setting is legal on v7x; raise per-gen for larger tiles on v5e/v6e.
    vmem_est = (2 * tn * D * 2          # x (bf16, 2 buffers)
                + 2 * tn * 1 * 4        # gate (f32)
                + 2 * D * two_th * 2    # w13 tile (bf16)
                + 2 * th * D * 2        # w2 tile (bf16)
                + 2 * tn * D * 4        # out (f32)
                + tn * D * 4)           # accumulator scratch
    vmem_limit = int(min(max(2 * vmem_est, 32 << 20), 64 << 20))

    out = pl.pallas_call(
        moe_expert_kernel,
        out_shape=jax.ShapeDtypeStruct((N_pad, D), jnp.float32),
        grid=(n_tok, E, n_h),
        in_specs=[
            pl.BlockSpec((tn, D), lambda n, e, h: (n, 0)),                 # x tile
            pl.BlockSpec((None, tn, 1), lambda n, e, h: (e, n, 0)),        # gate column
            pl.BlockSpec((None, None, D, two_th),
                         lambda n, e, h: (e, h, 0, 0)),                    # fused w1|w3
            pl.BlockSpec((None, th, D), lambda n, e, h: (e, h, 0)),        # w2 tile
        ],
        out_specs=pl.BlockSpec((tn, D), lambda n, e, h: (n, 0)),
        scratch_shapes=[pltpu.VMEM((tn, D), jnp.float32)],                 # f32 acc
        compiler_params=pltpu.CompilerParams(
            # token axis parallel (megacore on v7x); expert & h-tile axes accumulate
            dimension_semantics=("parallel", "arbitrary", "arbitrary"),
            vmem_limit_bytes=vmem_limit,
        ),
    )(x_flat, gate_e, w13, w2_t)
    return out[:N]


# ------------------------------ forward pass ----------------------------------
def ffn_moe_forward(x, prepared, *, top_k, moe_aux_loss_coef, block_tokens=512):
    B, T, D = x.shape
    N = B * T
    E = prepared["router"].shape[0]
    x_flat = x.reshape(N, D)

    # --- router (tiny matmul + softmax + top-k): plain-JAX glue ---
    logits = x_flat @ prepared["router"].T                          # (N, E)
    router_out = jax.nn.softmax(logits, axis=-1)
    topk_probs, topk_idx = jax.lax.top_k(router_out, top_k)         # (N, k)

    # dense per-expert gate weight: sum_k prob_k * 1[expert == idx_k] -> (N, E)
    onehots = jax.nn.one_hot(topk_idx, E, dtype=jnp.float32)        # (N, k, E)
    gate = jnp.einsum("nk,nke->ne", topk_probs, onehots)            # (N, E) f32
    gate_e = jnp.transpose(gate)[:, :, None]                        # (E, N, 1)

    # aux loss (same formula as the PyTorch module: top-1 density, un-renormalized)
    density = jax.nn.one_hot(topk_idx[:, 0], E, dtype=jnp.float32).mean(axis=0)
    router_prob_mean = router_out.mean(axis=0)
    aux_loss = moe_aux_loss_coef * jnp.sum(density * router_prob_mean) * E

    # --- expert SwiGLU FFNs + weighted accumulation: Pallas kernel ---
    out_flat = moe_experts_pallas(x_flat.astype(jnp.bfloat16), gate_e,
                                  prepared["w13"], prepared["w2_t"],
                                  block_tokens=block_tokens)
    return out_flat.reshape(B, T, D), aux_loss


# ------------------------------ reference (pure JAX, f32) ----------------------
def ffn_moe_reference(x, params, *, top_k, moe_aux_loss_coef):
    B, T, D = x.shape
    N = B * T
    E = params["router"].shape[0]
    x_flat = x.reshape(N, D)
    router_out = jax.nn.softmax(x_flat @ params["router"].T, axis=-1)
    topk_probs, topk_idx = jax.lax.top_k(router_out, top_k)
    out = jnp.zeros_like(x_flat)
    for e in range(E):
        h1 = x_flat @ params["w1"][e].T
        h3 = x_flat @ params["w3"][e].T
        y = ((h1 * jax.nn.sigmoid(h1)) * h3) @ params["w2"][e].T
        w = jnp.sum(topk_probs * (topk_idx == e), axis=-1, keepdims=True)
        out = out + y * w
    density = jax.nn.one_hot(topk_idx[:, 0], E, dtype=jnp.float32).mean(axis=0)
    aux = moe_aux_loss_coef * jnp.sum(density * router_out.mean(axis=0)) * E
    return out.reshape(B, T, D), aux


# ---------------------------------- main ---------------------------------------
if __name__ == "__main__":
    # config (mirrors the PyTorch dataclass fields used by the module)
    num_dims = 32
    num_experts = 4
    moe_topk = 2
    moe_aux_loss_coef = 0.01
    # hidden_dim derivation exactly as in FFNwMoE.__init__
    multiple_of = 4
    hidden_dim = int(2 * num_dims / 3)
    hidden_dim = multiple_of * ((hidden_dim + multiple_of - 1) // multiple_of)  # -> 24

    B, T, D, E, H = 2, 16, num_dims, num_experts, hidden_dim

    key = jax.random.PRNGKey(0)
    k_r, k_w1, k_w3, k_w2, k_x = jax.random.split(key, 5)
    lim_d = 1.0 / math.sqrt(D)
    lim_h = 1.0 / math.sqrt(H)
    params = {
        "router": jax.random.uniform(k_r, (E, D), jnp.float32, -lim_d, lim_d),
        "w1": jax.random.uniform(k_w1, (E, H, D), jnp.float32, -lim_d, lim_d),  # Linear(D->H)
        "w3": jax.random.uniform(k_w3, (E, H, D), jnp.float32, -lim_d, lim_d),  # Linear(D->H)
        "w2": jax.random.uniform(k_w2, (E, D, H), jnp.float32, -lim_h, lim_h),  # Linear(H->D)
    }
    x = jax.random.normal(k_x, (B, T, D), jnp.float32)

    # One-time weight prep (transpose + bf16 cast + fused/h-tiled layout).
    prepared = prepare_moe_weights(params, block_hidden=512)
    jax.block_until_ready(prepared)

    # block_tokens=16 -> N=32 gives 2 token tiles (exercises the tiled/parallel
    # token axis; also keeps >= 2 tiles for v7x megacore sharding).
    out, aux_loss = ffn_moe_forward(
        x, prepared, top_k=moe_topk, moe_aux_loss_coef=moe_aux_loss_coef,
        block_tokens=16,
    )
    jax.block_until_ready(out)
    jax.block_until_ready(aux_loss)

    # sanity check against a pure-JAX f32 reference (bf16 matmuls -> looser tolerance)
    out_ref, aux_ref = ffn_moe_reference(
        x, params, top_k=moe_topk, moe_aux_loss_coef=moe_aux_loss_coef
    )
    assert out.shape == (B, T, D)
    assert np.allclose(np.asarray(out), np.asarray(out_ref), atol=2e-2, rtol=2e-2)
    assert np.allclose(float(aux_loss), float(aux_ref), atol=1e-6)

    print("KERNEL_OK")
</pallas_src>

<mosaic_0001>
module attributes {stable_mosaic.version = 11 : i64} {
  func.func @moe_expert_kernel(%arg0: i32, %arg1: i32, %arg2: i32, %arg3: memref<16x32xbf16, #tpu.memory_space<vmem>>, %arg4: memref<1x16x1xf32, #tpu.memory_space<vmem>>, %arg5: memref<1x1x32x48xbf16, #tpu.memory_space<vmem>>, %arg6: memref<1x24x32xbf16, #tpu.memory_space<vmem>>, %arg7: memref<16x32xf32, #tpu.memory_space<vmem>>, %arg8: memref<16x32xf32, #tpu.memory_space<vmem>>) attributes {dimension_semantics = [#tpu.dimension_semantics<parallel>, #tpu.dimension_semantics<arbitrary>, #tpu.dimension_semantics<arbitrary>], iteration_bounds = array<i64: 2, 4, 1>, scalar_prefetch = 0 : i64, scratch_operands = 1 : i64, tpu.core_type = #tpu.core_type<tc>, window_params = [{transform_indices = @transform_0, window_bounds = array<i64: 16, 32>}, {transform_indices = @transform_1, window_bounds = array<i64: 1, 16, 1>}, {transform_indices = @transform_2, window_bounds = array<i64: 1, 1, 32, 48>}, {transform_indices = @transform_3, window_bounds = array<i64: 1, 24, 32>}, {transform_indices = @transform_4, window_bounds = array<i64: 16, 32>}]} {
    %c0_i32 = arith.constant 0 : i32
    %0 = arith.cmpi eq, %arg1, %c0_i32 : i32
    %c0_i32_0 = arith.constant 0 : i32
    %1 = arith.cmpi eq, %arg2, %c0_i32_0 : i32
    %2 = arith.andi %0, %1 : i1
    %3 = arith.extui %2 : i1 to i32
    %c0_i32_1 = arith.constant 0 : i32
    %4 = arith.cmpi ne, %3, %c0_i32_1 : i32
    scf.if %4 {
      %cst_21 = arith.constant 0.000000e+00 : f32
      %34 = vector.broadcast %cst_21 : f32 to vector<16x32xf32>
      %c0_22 = arith.constant 0 : index
      %c0_23 = arith.constant 0 : index
      %35 = vector.load %arg8[%c0_22, %c0_23] : memref<16x32xf32, #tpu.memory_space<vmem>>, vector<16x32xf32>
      tpu.vector_store %arg8[%c0_22, %c0_23], %34 {strides = array<i32>} : memref<16x32xf32, #tpu.memory_space<vmem>>, vector<16x32xf32>,
    } else {
    }
    %c0 = arith.constant 0 : index
    %c0_2 = arith.constant 0 : index
    %5 = vector.load %arg3[%c0, %c0_2] : memref<16x32xbf16, #tpu.memory_space<vmem>>, vector<16x32xbf16>
    %c0_3 = arith.constant 0 : index
    %c0_4 = arith.constant 0 : index
    %c0_5 = arith.constant 0 : index
    %c0_6 = arith.constant 0 : index
    %6 = vector.load %arg5[%c0_3, %c0_4, %c0_5, %c0_6] : memref<1x1x32x48xbf16, #tpu.memory_space<vmem>>, vector<1x1x32x48xbf16>
    %7 = vector.shape_cast %6 : vector<1x1x32x48xbf16> to vector<32x48xbf16>
    %cst = arith.constant dense<0.000000e+00> : vector<16x48xf32>
    %8 = tpu.matmul %5, %7, %cst {dimension_numbers = #tpu.dot_dimension_numbers<[1], [0], [0], [1], [0, 0, 1, 1], [], []>} : vector<16x32xbf16>, vector<32x48xbf16>, vector<16x48xf32> -> vector<16x48xf32>
    %9 = vector.extract_strided_slice %8 {offsets = [0, 0], sizes = [16, 24], strides = [1, 1]} : vector<16x48xf32> to vector<16x24xf32>
    %10 = vector.extract_strided_slice %8 {offsets = [0, 24], sizes = [16, 24], strides = [1, 1]} : vector<16x48xf32> to vector<16x24xf32>
    %c0_7 = arith.constant 0 : index
    %c0_8 = arith.constant 0 : index
    %c0_9 = arith.constant 0 : index
    %11 = vector.load %arg4[%c0_7, %c0_8, %c0_9] : memref<1x16x1xf32, #tpu.memory_space<vmem>>, vector<1x16x1xf32>
    %12 = vector.shape_cast %11 : vector<1x16x1xf32> to vector<16x1xf32>
    %13 = arith.negf %9 : vector<16x24xf32>
    %14 = math.exp %13 : vector<16x24xf32>
    %cst_10 = arith.constant 1.000000e+00 : f32
    %15 = vector.broadcast %cst_10 : f32 to vector<16x24xf32>
    %16 = arith.addf %15, %14 : vector<16x24xf32>
    %17 = arith.divf %15, %16 : vector<16x24xf32>
    %18 = arith.mulf %9, %17 : vector<16x24xf32>
    %19 = arith.mulf %18, %10 : vector<16x24xf32>
    %20 = vector.broadcast %12 : vector<16x1xf32> to vector<16x24xf32>
    %21 = arith.mulf %19, %20 : vector<16x24xf32>
    %c0_11 = arith.constant 0 : index
    %c0_12 = arith.constant 0 : index
    %22 = vector.load %arg8[%c0_11, %c0_12] : memref<16x32xf32, #tpu.memory_space<vmem>>, vector<16x32xf32>
    %23 = arith.truncf %21 : vector<16x24xf32> to vector<16x24xbf16>
    %c0_13 = arith.constant 0 : index
    %c0_14 = arith.constant 0 : index
    %c0_15 = arith.constant 0 : index
    %24 = vector.load %arg6[%c0_13, %c0_14, %c0_15] : memref<1x24x32xbf16, #tpu.memory_space<vmem>>, vector<1x24x32xbf16>
    %25 = vector.shape_cast %24 : vector<1x24x32xbf16> to vector<24x32xbf16>
    %cst_16 = arith.constant dense<0.000000e+00> : vector<16x32xf32>
    %26 = tpu.matmul %23, %25, %cst_16 {dimension_numbers = #tpu.dot_dimension_numbers<[1], [0], [0], [1], [0, 0, 1, 1], [], []>} : vector<16x24xbf16>, vector<24x32xbf16>, vector<16x32xf32> -> vector<16x32xf32>
    %27 = arith.addf %22, %26 : vector<16x32xf32>
    %c0_17 = arith.constant 0 : index
    %c0_18 = arith.constant 0 : index
    %28 = vector.load %arg8[%c0_17, %c0_18] : memref<16x32xf32, #tpu.memory_space<vmem>>, vector<16x32xf32>
    tpu.vector_store %arg8[%c0_17, %c0_18], %27 {strides = array<i32>} : memref<16x32xf32, #tpu.memory_space<vmem>>, vector<16x32xf32>,
    %c3_i32 = arith.constant 3 : i32
    %29 = arith.cmpi eq, %arg1, %c3_i32 : i32
    %c0_i32_19 = arith.constant 0 : i32
    %30 = arith.cmpi eq, %arg2, %c0_i32_19 : i32
    %31 = arith.andi %29, %30 : i1
    %32 = arith.extui %31 : i1 to i32
    %c0_i32_20 = arith.constant 0 : i32
    %33 = arith.cmpi ne, %32, %c0_i32_20 : i32
    scf.if %33 {
      %c0_21 = arith.constant 0 : index
      %c0_22 = arith.constant 0 : index
      %34 = vector.load %arg8[%c0_21, %c0_22] : memref<16x32xf32, #tpu.memory_space<vmem>>, vector<16x32xf32>
      %c0_23 = arith.constant 0 : index
      %c0_24 = arith.constant 0 : index
      %35 = vector.load %arg7[%c0_23, %c0_24] : memref<16x32xf32, #tpu.memory_space<vmem>>, vector<16x32xf32>
      tpu.vector_store %arg7[%c0_23, %c0_24], %34 {strides = array<i32>} : memref<16x32xf32, #tpu.memory_space<vmem>>, vector<16x32xf32>,
    } else {
    }
    return
  }
  func.func @transform_0(%arg0: i32, %arg1: i32, %arg2: i32) -> (i32, i32) {
    %c0_i32 = arith.constant 0 : i32
    %c0_i32_0 = arith.constant 0 : i32
    return %arg0, %c0_i32 : i32, i32
  }
  func.func @transform_1(%arg0: i32, %arg1: i32, %arg2: i32) -> (i32, i32, i32) {
    %c0_i32 = arith.constant 0 : i32
    %c0_i32_0 = arith.constant 0 : i32
    return %arg1, %arg0, %c0_i32 : i32, i32, i32
  }
  func.func @transform_2(%arg0: i32, %arg1: i32, %arg2: i32) -> (i32, i32, i32, i32) {
    %c0_i32 = arith.constant 0 : i32
    %c0_i32_0 = arith.constant 0 : i32
    %c0_i32_1 = arith.constant 0 : i32
    return %arg1, %arg2, %c0_i32, %c0_i32_0 : i32, i32, i32, i32
  }
  func.func @transform_3(%arg0: i32, %arg1: i32, %arg2: i32) -> (i32, i32, i32) {
    %c0_i32 = arith.constant 0 : i32
    %c0_i32_0 = arith.constant 0 : i32
    return %arg1, %arg2, %c0_i32 : i32, i32, i32
  }
  func.func @transform_4(%arg0: i32, %arg1: i32, %arg2: i32) -> (i32, i32) {
    %c0_i32 = arith.constant 0 : i32
    %c0_i32_0 = arith.constant 0 : i32
    return %arg0, %c0_i32 : i32, i32
  }
}

</mosaic_0001>

<bundles_post_ra>
// kernel: tpu_custom_call.1
= control target key start
LH: loop header
LB: loop body
LE: loop exit
PB: predicated region body
PF: predicated region fallthrough
CT: control target
= control target key end

     0   :  { %9 = vsyncpa [#allocation4], 0  ;;  %s1107_s0 = inlined_call_operand.vmem [shape: bf16[32,32], index: 0, kind: input, shape index: {}]   ;;  %s1108_s1 = inlined_call_operand.vmem [shape: f32[4,32,1], index: 1, kind: input, shape index: {}]   ;;  %s1109_s2 = inlined_call_operand.vmem [shape: bf16[4,1,32,48], index: 2, kind: input, shape index: {}]   ;;  %s1110_s3 = inlined_call_operand.vmem [shape: bf16[4,24,32], index: 3, kind: input, shape index: {}]   ;;  %s1111_s4 = inlined_call_operand.hbm [shape: f32[32,32], index: 4, kind: output, shape index: {}]  }
   0x1   :  { %11 = vsyncpa [#allocation4 + $0x1], 0  ;;  %s942_s15 = smov 0   ;;  %s944_s16 = smov 0  }
   0x2   :  { %s946_s17 = smov 0   ;;  %s948_s18 = smov 0  }
   0x3   :  { %s950_s19 = smov 0   ;;  %s952_s20 = smov 0  }
   0x4   :  { %s954_s21 = smov 0   ;;  %s956_s22 = smov 0  }
   0x5 LB: > { %1119 = sst [smem:[#allocation6_spill]] %s879_s15  ;;  %s664_s23 = sadd.s32 4294967295, %s907_s22   ;;  %s907_s22 = sphi %s956_s22, %s17_s22   ;;  %s903_s21 = sphi %s954_s21, %s1137_s21   ;;  %s899_s20 = sphi %s952_s20, %s1141_s20   ;;  %s895_s19 = sphi %s950_s19, %s1135_s19   ;;  %s891_s18 = sphi %s948_s18, %s1140_s18   ;;  %s887_s17 = sphi %s946_s17, %s1133_s17   ;;  %s883_s16 = sphi %s944_s16, %s1139_s16   ;;  %s879_s15 = sphi %s942_s15, %s1138_s15  }
   0x6   : > { %1120 = sst [smem:[#allocation7_spill]] %s887_s17  ;;  %s665_s24 = sadd.s32 4294967294, %s907_s22  }
   0x7   : > { %1121 = sst [smem:[#allocation8_spill]] %s899_s20  ;;  %s32_s25 = sadd.s32 1, %s899_s20 }
   0x8   : > { %1122 = sst [smem:[#allocation9_spill]] %s903_s21  ;;  %p34_p0 = scmp.ge.s32.totalorder %s32_s25, 4 }
   0x9   : > { %s36_s26 = sadd.s32 1, %s903_s21  ;;  %p163_p1 = scmp.ne.s32.totalorder %s887_s17, %s883_s16 }
   0xa   : > { %p164_p2 = scmp.eq.s32.totalorder %s664_s23, 7  ;;  %s1143_s25 = smov (%p34_p0, %s32_s25), 0 }
   0xb   : > { %1123 = sst [smem:[#allocation10_spill]] %s1143_s25  ;;  %s1145_s26 = smov (!%p34_p0, %s36_s26), %s903_s21 }
   0xc   : > { %p991_p3 = por %p164_p2, %p163_p1  ;;  %p169_p4 = scmp.ne.s32.totalorder %s883_s16, %s879_s15 }
   0xd   : > { %p38_p5 = scmp.ge.s32.totalorder %s1145_s26, 2  ;;  %p170_p6 = scmp.eq.s32.totalorder %s665_s24, 7 }
   0xe   : > { %p668_p7 = scmp.ge.s32.totalorder %s907_s22, 1  ;;  %p235_p8 = scmp.lt.s32.totalorder %s907_s22, 9 }
   0xf   : > { %s1147_s26 = smov (%p38_p5, %s1145_s26), 0  ;;  %p1001_p9 = por %p170_p6, %p169_p4 }
  0x10   : > { %1125 = sst [smem:[#allocation11_spill]] %s1147_s26  ;;  %p236_p10 = pnand %p668_p7, %p235_p8 }
  0x11   : > { %s1126_s28 = scalar_select %p1001_p9, 1, 0 }
  0x12   : > { %s150_s29 = ssub.s32 %s903_s21, %s1147_s26  ;;  %s153_s30 = sadd.s32 1, %s887_s17 }
  0x13   : > { %1127 = sst [smem:[#allocation12_spill]] %s1126_s28  ;;  %p151_p11 = scmp.eq.s32.totalorder %s150_s29, 0 }
  0x14   : > { %239 = sbr.rel (%p236_p10) target bundleno = 633 (0x279), region = 36  ;;  %s1114_s6 = sand.u32 (!%p236_p10), 1, %s883_s16  }
  0x15   : > { %s1009_s5 = scalar_select %p151_p11, %s887_s17, %s153_s30  }
  0x16   : > { %s670_s7 = sshll.u32 (!%p236_p10), %s895_s19, 1  ;;  %s669_s8 = sshll.u32 (!%p236_p10), %s1114_s6, 4 }
  0x17   : > { %1128 = sst [smem:[#allocation13_spill]] %s1009_s5  ;;  %p289_p12 = scmp.lt.s32.totalorder (!%p236_p10), %s670_s7, 3 }
  0x18   : > { %p295_p13 = scmp.lt.s32.totalorder (!%p236_p10), %s891_s18, 3  ;;  %p325_p0 = scmp.eq.s32.totalorder (!%p236_p10), %s891_s18, 0 }
  0x19   : > { %s1032_s11 = scalar_lea.vmem (!%p236_p10), [#allocation3], %s669_s8 }
  0x1b   : > { %s1149_s7 = smov (!%p289_p12, %s670_s7), 3  ;;  %vm331_vm0 = vcmask (%p325_p0), 261120   ;;  %v909_v0 = vmov (%p325_p0), 0.0  }
  0x1c   : > { %s296_s9 = scalar_select %p295_p13, %s891_s18, 3 }
  0x1d   : > { %s671_s10 = sshll.u32 %s1149_s7, 2  ;;  %330 = sbr.rel (!%p325_p0) target bundleno = 36 (0x24), region = 40  ;;  %332 = vst.msk [vmem:[#allocation2] sm:$0xff] (%p325_p0), %vm331_vm0, %v909_v0  ;;  %333 = vst.msk [vmem:[#allocation2 + $0x8] sm:$0xff] (%p325_p0), %vm331_vm0, %v909_v0 }
  0x1e   : > { %s292_s13 = scalar_lea.vmem %s1107_s0, %s671_s10  ;;  %s673_s14 = sshll.u32 %s296_s9, 2 }
  0x1f   : > { %s300_s23 = sadd.s32 %s673_s14, %s1149_s7  ;;  %s694_s24 = sshll.u32 %s296_s9, 4 }
  0x20   : > { %s674_s29 = sshll.u32 %s300_s23, 3  ;;  %s312_s25 = scalar_lea.vmem %s1109_s2, %s694_s24 }
  0x21   : > { %s302_s20 = scalar_lea.vmem %s1108_s1, %s674_s29  ;;  %s720_s5 = smul.u32 12, %s296_s9 }
  0x23   : > { %s1030_s15 = scalar_lea.vmem %s1110_s3, %s720_s5 }
  0x24 PF: > { %v800_v1 = vld [vmem:[%s312_s25] sm:$0xff]   ;;  %v910_v2 = vmov 0.0   ;;  %v801_v3 = vld [vmem:[%s312_s25 + $0x8] sm:$0xff]   ;;  %vm911_vm1 = vmmov 0   ;;  %v912_v5 = vmov 0   ;;  %vm357_vm2 = vcmask 261120  }
  0x25   : > { %704 = vmatprep.subr.bf16.mxu0 %v910_v2  ;;  %712 = vmatprep.subr.bf16.mxu1 %v910_v2  ;;  %v402_v4 = vld [vmem:[%s302_s20] sm:$0xff]  ;;  %v403_v7 = vld [vmem:[%s302_s20 + $0x8] sm:$0xff]  ;;  %vm459_vm3 = vcmask 1043456   ;;  %s913_s17 = smov 104   ;;  %vm455_vm4 = vcmask 195584   ;;  %p508_p1 = scmp.eq.s32.totalorder %s891_s18, 3 }
  0x26   : > { %705 = vmatpush3.bf16.msra.mxu0 %v800_v1  ;;  %708 = vmatprep.mubr.msk.bf16.mxu0 %vm911_vm1, %v910_v2  ;;  %v802_v6 = vld [vmem:[%s292_s13] sm:$0xff]   ;;  %v804_v9 = vld [vmem:[%s1030_s15 + $0x8] ss:$0 sps:$4 sm:$0xff]  }
  0x27   : > { %706 = vmatprep.subr.bf16.mxu0 %v910_v2  ;;  %716 = vmatprep.mubr.msk.bf16.mxu1 %vm911_vm1, %v910_v2  ;;  %v803_v8 = vld [vmem:[%s1030_s15] sm:$0xff]   ;;  %v461_v10 = vsel %vm459_vm3, %v804_v9, 0  ;;  %v441_v36 = vld [vmem:[#allocation2 + $0x8] sm:$0xff] }
  0x28   : > { %799 = vset.pattern.permute.xlu0 %v912_v5  ;;  %713 = vmatpush3.bf16.msra.mxu1 %v803_v8  ;;  %v440_v34 = vld [vmem:[#allocation2] sm:$0xff] }
  0x29   : > { %430 = vperm.xlu0 %799, %v402_v4   ;;  %714 = vmatprep.subr.bf16.mxu1 %v910_v2 }
  0x2a   : > { %707 = vmatpush3.bf16.msra.mxu0 %v801_v3 }
  0x2c   : > { %715 = vmatpush3.bf16.msra.mxu1 %v461_v10 }
  0x2d   : > { %709 = vmatmul.mubr.msk.bf16.vlgmr.msra.gmra.mrb[0].mxu0 %vm357_vm2, %v802_v6  ;;  %435 = vperm.xlu0 %799, %v403_v7  }
  0xa8   : > { %v431_v23 = vpop.permute.xlu0 %430 }
  0xac   : > { %v436_v30 = vpop.permute.xlu0 %435 }
 0x100   : > { %v395_v11 = vpop.f32.mrb[0].mxu0 }
 0x101   : > { %420 = vrot.lane.b32.xlu1 %v395_v11, %s913_s17  ;;  %v710_v12 = vpop.f32.mrb[1].mxu0  ;;  %v683_v15 = vmul.f32 -1.442695, %v395_v11 }
 0x102   : > { %v398_v13 = vpop.f32.mrb[2].mxu0 }
 0x103   : > { %v711_v14 = vpop.f32.mrb[3].mxu0  ;;  %v684_v16 = vmul.f32 -1.442695, %v398_v13  ;;  %805 = vpow2.f32 %v683_v15 }
 0x105   : > { %422 = vrot.lane.b32.xlu1 %v398_v13, %s913_s17  ;;  %807 = vpow2.f32 %v684_v16 }
 0x10d   : > { %v806_v17 = vpop.eup %805 }
 0x10e   : > { %v410_v19 = vadd.f32 1.0, %v806_v17 }
 0x10f   : > { %v808_v18 = vpop.eup %807 }
 0x110   : > { %v411_v20 = vadd.f32 1.0, %v808_v18  ;;  %809 = vrcp.f32 %v410_v19 }
 0x112   : > { %811 = vrcp.f32 %v411_v20 }
 0x11a   : > { %v810_v21 = vpop.eup %809 }
 0x11b   : > { %v416_v25 = vmul.f32 %v810_v21, %v395_v11 }
 0x11c   : > { %v812_v22 = vpop.eup %811 }
 0x11d   : > { %v417_v27 = vmul.f32 %v812_v22, %v398_v13 }
 0x173   : > { %v421_v24 = vpop.permute.xlu1 %420 }
 0x174   : > { %v426_v26 = vmul.f32 %v421_v24, %v416_v25 }
 0x176   : > { %v438_v31 = vmul.f32 %v431_v23, %v426_v26 }
 0x177   : > { %v423_v28 = vpop.permute.xlu1 %422 }
 0x178   : > { %v427_v29 = vmul.f32 %v423_v28, %v417_v27 }
 0x17a   : > { %v439_v32 = vmul.f32 %v436_v30, %v427_v29 }
 0x17c   : > { %v442_v33 = vpack.c.bf16 %v439_v32, %v438_v31 }
 0x17e   : > { %717 = vmatmul.mubr.msk.bf16.vlgmr.msra.gmra.mrb[0].mxu1 %vm455_vm4, %v442_v33 }
 0x250   : > { %512 = sbr.rel (!%p508_p1) target bundleno = 607 (0x25f), region = 44 }
 0x251   : > { %v497_v35 = vpop.f32.mrb[0].mxu1 }
 0x252   : > { %v504_v37 = vadd.f32 %v497_v35, %v440_v34  ;;  %v718_v38 = vpop.f32.mrb[1].mxu1 }
 0x253   : > { %v500_v39 = vpop.f32.mrb[2].mxu1 }
 0x254   : > { %506 = vst.msk [vmem:[#allocation2] sm:$0xff] %vm357_vm2, %v504_v37  ;;  %v505_v40 = vadd.f32 %v500_v39, %v441_v36  ;;  %v719_v41 = vpop.f32.mrb[3].mxu1 }
 0x256   : > { %507 = vst.msk [vmem:[#allocation2 + $0x8] sm:$0xff] %vm357_vm2, %v505_v40 }
 0x25b   : > { %v513_v42 = vld [vmem:[#allocation2] sm:$0xff] }
 0x25c   : > { %515 = vst.msk [vmem:[%s1032_s11] sm:$0xff] %vm357_vm2, %v513_v42 }
 0x25d   : > { %v514_v43 = vld [vmem:[#allocation2 + $0x8] sm:$0xff] }
 0x25e   : > { %516 = vst.msk [vmem:[%s1032_s11 + $0x8] sm:$0xff] %vm357_vm2, %v514_v43 }
 0x25f PF: > { %s697_s15 = sshll.u32 %s895_s19, 8  ;;  %s531_s25 = sshll.u32 %s1032_s11, 4  ;;  %s1051_s25 = int_to_ptr.vmem [resolvable:$true] %s531_s25 }
 0x260   : > { %s1048_s21 = scalar_lea.hbm %s1111_s4, %s697_s15  ;;  %s1129_s26 = sand.u32 1, %s883_s16  }
 0x261   : > { %s1055_s28 = scalar_lea.sflag [#allocation4], %s1129_s26  ;;  %s813_s5 = scalar_lea.vmem %s1051_s25, 256 }
 0x262   : > { %p814_p2 = scmp.ne.s32.totalorder %s1051_s25, %s813_s5  ;;  %s914_s19 = smov [#allocation3]  }
 0x263   : > { %s817_s6 = sshll.u32 %s914_s19, 4  ;;  %s818_s6 = int_to_ptr.vmem [resolvable:$false] %s817_s6 }
 0x264   : > { %p815_p4 = pnand %p814_p2, %p991_p3  ;;  %s819_s7 = scalar_lea.vmem %s818_s6, 512 }
 0x265   : > { %p820_p6 = scmp.lt.s32.totalorder %s1051_s25, %s818_s6  ;;  %p821_p7 = scmp.lt.s32.totalorder %s819_s7, %s813_s5 }
 0x266   : > { %p816_p5 = pneg %p815_p4 }
 0x267   : > { %p822_p8 = por %p821_p7, %p820_p6 }
 0x269   : > { %p823_p10 = pnand %p822_p8, %p816_p5 }
 0x26b   : > { %826 = shalt.err (!%p823_p10)
}
 0x26c   : > { %s827_s8 = scalar_lea.hbm %s1048_s21, 256  ;;  %s831_s12 = scalar_lea.hbm %s1111_s4, 512 }
 0x26d   : > { %p828_p11 = scmp.ne.s32.totalorder %s1048_s21, %s827_s8  ;;  %p832_p0 = scmp.lt.u32.totalorder %s1048_s21, %s1111_s4 }
 0x26e   : > { %p833_p1 = scmp.lt.u32.totalorder %s831_s12, %s827_s8  ;;  %p835_p4 = scmp.lt.u32.totalorder %s827_s8, %s1048_s21 }
 0x26f   : > { %p829_p12 = pnand %p828_p11, %p991_p3 }
 0x270   : > { %p834_p2 = por %p833_p1, %p832_p0 }
 0x271   : > { %p830_p13 = pneg %p829_p12 }
 0x272   : > { %p836_p5 = por %p835_p4, %p834_p2 }
 0x274   : > { %p837_p6 = pnand %p836_p5, %p830_p13 }
 0x276   : > { %840 = shalt.err (!%p837_p6)
}
 0x277   : > { %s915_s23 = smov 128   ;;  %s916_s24 = smov 8  }
 0x278   : > { %721 = dma.vmem_to_hbm [thread:$0]  (%p991_p3), %s1051_s25, 256, %s1048_s21, %s1055_s28, %s915_s23, %s915_s23, %s916_s24  }
 0x279 PF: > { %s1130_s29 = sld [smem:[#allocation6_spill]]  ;;  %p727_p7 = scmp.ge.s32.totalorder %s907_s22, 2 }
 0x27b   : > { %p724_p8 = pnand %p727_p7, %p1001_p9 }
 0x27f   : > { %s546_s11 = sand.u32 1, %s1130_s29  }
 0x280   : > { %s547_s17 = scalar_lea.sflag [#allocation4], %s546_s11 }
 0x281   : > { %874 = dma.done.wait (!%p724_p8), %s547_s17, 256  }
 0x282   : > { %876 = vsyncadd (!%p724_p8), %s547_s17, 4294967040  ;;  %s17_s22 = sadd.s32 1, %s907_s22   ;;  %s1132_s18 = sld [smem:[#allocation7_spill]] }
 0x283   : > { %p14_p10 = scmp.ge.s32.totalorder %s17_s22, 10   ;;  %s1133_s17 = sld [smem:[#allocation13_spill]] }
 0x284   : > { %s1134_s20 = sld [smem:[#allocation8_spill]]  ;;  %s1135_s19 = sld [smem:[#allocation9_spill]] }
 0x285   : > { %s1136_s27 = sld [smem:[#allocation10_spill]]  ;;  %s1137_s21 = sld [smem:[#allocation11_spill]] }
 0x286   : > { %s1138_s15 = smov %s883_s16  ;;  %16 = sbr.rel (!%p14_p10) target bundleno = 5 (0x5), region = 88 }
 0x288   : > { %s1139_s16 = smov %s1132_s18 }
 0x28a   : > { %s1140_s18 = smov %s1134_s20 }
 0x28b   : > { %s1141_s20 = smov %s1136_s27 }
 0x28d   :  { %552 = vsyncpa [#allocation4], 1 }
 0x28e   :  { %554 = vsyncpa [#allocation4 + $0x1], 1 }

</bundles_post_ra>
